<compile_context>
chip_gen: v6e
topology: v6e:2x2x1
jax: 0.10.0
libtpu: 0.0.40
codegen_flags: <defaults>
</compile_context>

<pallas_src>
import jax
import jax.numpy as jnp
from jax import lax
from jax.experimental import pallas as pl
from jax.experimental.pallas import tpu as pltpu

_LANE = 128


def _round_up(n, m):
    return ((n + m - 1) // m) * m


# ---------------------------------------------------------------------------
# Stateless counter-based PRNG for dropout (portable: pure uint32 VPU ops).
# ---------------------------------------------------------------------------

def _hash_u32(x):
    """splitmix32-style finalizer on uint32 arrays."""
    x = x ^ (x >> 16)
    x = x * jnp.uint32(0x7FEB352D)
    x = x ^ (x >> 15)
    x = x * jnp.uint32(0x846CA68B)
    x = x ^ (x >> 16)
    return x


def _dropout(h, p, seed_u32, layer_salt, row0_u32):
    """Inverted dropout (F.dropout(training=True) semantics).

    keep iff hash(seed, layer, global_row, col) >= p * 2^32  ->  P(keep) = 1 - p.
    """
    thresh = jnp.uint32(min(int(round(p * float(2 ** 32))), 2 ** 32 - 1))
    rows = lax.broadcasted_iota(jnp.int32, h.shape, 0).astype(jnp.uint32) + row0_u32
    cols = lax.broadcasted_iota(jnp.int32, h.shape, 1).astype(jnp.uint32)
    ctr = (rows * jnp.uint32(0x85EBCA6B)) ^ (cols * jnp.uint32(0x27D4EB2F))
    ctr = ctr ^ (seed_u32 * jnp.uint32(0x9E3779B1) + jnp.uint32(layer_salt))
    keep = _hash_u32(ctr) >= thresh
    return jnp.where(keep, h * jnp.float32(1.0 / (1.0 - p)), jnp.float32(0.0))


# ---------------------------------------------------------------------------
# Fused-MLP kernel
# ---------------------------------------------------------------------------

def _make_kernel(num_layers, drop_p, drop_bool, drop_bool_ll, nonlinearity,
                 batch_tile):
    """Builds the fused-MLP kernel body (layer count / dropout flags are static)."""
    n_lin = 1 if num_layers == 0 else num_layers + 1
    use_drop = drop_p > 0.0 and (drop_bool or drop_bool_ll)

    def kernel(seed_ref, *refs):
        x_ref = refs[0]
        out_ref = refs[-1]
        wb = refs[1:-1]  # alternating (w, b) refs, n_lin pairs

        if use_drop:
            seed_u32 = seed_ref[0].astype(jnp.uint32)
            # Different batch tiles must get different masks.
            row0_u32 = (pl.program_id(0) * batch_tile).astype(jnp.uint32)
        else:
            seed_u32 = None
            row0_u32 = None

        h = x_ref[...].astype(jnp.float32)

        if num_layers == 0:
            # dropout on the input (drop_bool_ll), then single linear layer
            if drop_bool_ll and drop_p > 0.0:
                h = _dropout(h, drop_p, seed_u32, 0, row0_u32)
            w = wb[0][...]
            b = wb[1][...]
            h = jnp.dot(h.astype(w.dtype), w,
                        preferred_element_type=jnp.float32) + b
        else:
            for i in range(n_lin):
                w = wb[2 * i][...]          # [in, out], compute dtype (bf16)
                b = wb[2 * i + 1][...]      # [1, out], f32
                h = jnp.dot(h.astype(w.dtype), w,
                            preferred_element_type=jnp.float32) + b
                if i < n_lin - 1:           # hidden layers: nonlinearity + dropout
                    h = nonlinearity(h)
                    if i < n_lin - 2:
                        if drop_bool and drop_p > 0.0:
                            h = _dropout(h, drop_p, seed_u32, i + 1, row0_u32)
                    else:                   # layers[-2] uses the "last layer" flag
                        if drop_bool_ll and drop_p > 0.0:
                            h = _dropout(h, drop_p, seed_u32, i + 1, row0_u32)

        out_ref[...] = h.astype(out_ref.dtype)

    return kernel


# ---------------------------------------------------------------------------
# Wrapper
# ---------------------------------------------------------------------------

def net_forward(x, weights, biases, *, num_layers, drop_p, drop_bool,
                drop_bool_ll, seed=0, nonlinearity=jax.nn.relu,
                compute_dtype=jnp.bfloat16, batch_tile=None):
    """Runs Net.forward as one Pallas call.

    weights[i]: [out_features, in_features] (PyTorch layout), biases[i]: [out].
    compute_dtype: matmul operand dtype (bf16 by default for MXU throughput;
    pass jnp.float32 for closest-to-reference numerics).
    Note: `seed` is a runtime scalar (SMEM), so new seeds do not recompile
    when this wrapper is wrapped in jax.jit.
    """
    batch, n_in = x.shape
    n_lin = 1 if num_layers == 0 else num_layers + 1
    assert len(weights) == n_lin and len(biases) == n_lin
    n_out = weights[-1].shape[0]
    n_out_pad = _round_up(n_out, _LANE)          # lane-dense output stores

    if batch_tile is None:
        batch_tile = min(512, _round_up(max(batch, 8), 8))
    batch_tile = max(8, _round_up(batch_tile, 8))
    batch_pad = _round_up(batch, batch_tile)

    x_p = x.astype(compute_dtype)
    if batch_pad != batch:
        x_p = jnp.pad(x_p, ((0, batch_pad - batch), (0, 0)))

    seed_arr = jnp.asarray(seed, dtype=jnp.int32).reshape(1)

    args = [seed_arr, x_p]
    in_specs = [
        pl.BlockSpec(memory_space=pltpu.MemorySpace.SMEM),        # seed scalar
        pl.BlockSpec((batch_tile, n_in), lambda i: (i, 0)),       # x tile
    ]

    # Pre-transposed [in, out] weights in compute dtype; f32 biases; the last
    # layer's columns are zero-padded up to the 128-lane boundary.
    # TODO(synk): for very large layer_width on v7x (64 MiB VMEM), stream the
    # weights per layer with pltpu.emit_pipeline instead of keeping them all
    # resident in VMEM.
    for li, (w, b) in enumerate(zip(weights, biases)):
        wt = jnp.asarray(w, jnp.float32).T.astype(compute_dtype)   # [in, out]
        bt = jnp.asarray(b, jnp.float32).reshape(1, -1)            # [1, out]
        if li == n_lin - 1 and n_out_pad != n_out:
            wt = jnp.pad(wt, ((0, 0), (0, n_out_pad - n_out)))
            bt = jnp.pad(bt, ((0, 0), (0, n_out_pad - n_out)))
        args.append(wt)
        args.append(bt)
        in_specs.append(pl.BlockSpec(wt.shape, lambda i: (0, 0)))  # resident
        in_specs.append(pl.BlockSpec(bt.shape, lambda i: (0, 0)))  # resident

    kernel = _make_kernel(num_layers, float(drop_p), bool(drop_bool),
                          bool(drop_bool_ll), nonlinearity, batch_tile)

    out = pl.pallas_call(
        kernel,
        grid=(batch_pad // batch_tile,),
        out_shape=jax.ShapeDtypeStruct((batch_pad, n_out_pad), jnp.float32),
        in_specs=in_specs,
        out_specs=pl.BlockSpec((batch_tile, n_out_pad), lambda i: (i, 0)),
        compiler_params=pltpu.CompilerParams(
            dimension_semantics=("parallel",)),   # shard batch tiles across TCs (v7x)
    )(*args)

    return out[:batch, :n_out]


# ---------------------------------------------------------------------------
# Parameter init + reference
# ---------------------------------------------------------------------------

def init_params(key, n_input, layer_width, num_layers, n_output):
    """Deterministic init matching corr_init_matrix's range:
    weights uniform in (-sqrt(1/in), sqrt(1/in)); biases use the same bound.
    # TODO(synk): the correlated-Gaussian-CDF structure of corr_init_matrix is
    # not reproduced exactly (only its scale/range); init-time glue only.
    """
    if num_layers == 0:
        dims = [(n_input, n_output)]
    else:
        dims = [(n_input, layer_width)]
        dims += [(layer_width, layer_width)] * (num_layers - 1)
        dims += [(layer_width, n_output)]

    weights, biases = [], []
    for (fan_in, fan_out) in dims:
        key, kw, kb = jax.random.split(key, 3)
        bound = (1.0 / fan_in) ** 0.5
        weights.append(jax.random.uniform(kw, (fan_out, fan_in), jnp.float32,
                                          -bound, bound))
        biases.append(jax.random.uniform(kb, (fan_out,), jnp.float32,
                                         -bound, bound))
    return weights, biases


def _ref_forward_eval(x, weights, biases, num_layers, nonlinearity):
    """Plain-JAX eval-mode (no dropout) reference."""
    h = x
    n_lin = len(weights)
    if num_layers == 0:
        return h @ weights[0].T + biases[0]
    for i, (w, b) in enumerate(zip(weights, biases)):
        h = h @ w.T + b
        if i < n_lin - 1:
            h = nonlinearity(h)
    return h


if __name__ == "__main__":
    # net_params / train_params analogue (small shapes)
    n_input, layer_width, num_layers, n_output = 4, 32, 3, 1
    drop_p = 0.1
    batch = 8

    key = jax.random.PRNGKey(0)
    key, kx = jax.random.split(key)
    x = jax.random.normal(kx, (batch, n_input), jnp.float32)

    weights, biases = init_params(key, n_input, layer_width, num_layers, n_output)

    # Eval-mode forward, f32 compute — check against the plain-JAX reference.
    y_eval = net_forward(x, weights, biases, num_layers=num_layers,
                         drop_p=drop_p, drop_bool=False, drop_bool_ll=False,
                         compute_dtype=jnp.float32)
    jax.block_until_ready(y_eval)
    y_ref = _ref_forward_eval(x, weights, biases, num_layers, jax.nn.relu)
    assert y_eval.shape == (batch, n_output)
    assert jnp.allclose(y_eval, y_ref, atol=2e-3, rtol=2e-3)

    # Eval-mode forward with default bf16 compute dtype.
    y_eval_bf16 = net_forward(x, weights, biases, num_layers=num_layers,
                              drop_p=drop_p, drop_bool=False, drop_bool_ll=False)
    jax.block_until_ready(y_eval_bf16)
    assert y_eval_bf16.shape == (batch, n_output)

    # Train-mode forward (dropout active; runtime SMEM seed, in-kernel hash PRNG).
    y_train = net_forward(x, weights, biases, num_layers=num_layers,
                          drop_p=drop_p, drop_bool=True, drop_bool_ll=True,
                          seed=1234)
    jax.block_until_ready(y_train)
    assert y_train.shape == (batch, n_output)
    assert bool(jnp.all(jnp.isfinite(y_train)))

    # num_layers == 0 path (dropout on the input, single linear layer).
    w0, b0 = init_params(jax.random.PRNGKey(7), n_input, layer_width, 0, n_output)
    y_lin = net_forward(x, w0, b0, num_layers=0, drop_p=drop_p,
                        drop_bool=True, drop_bool_ll=True, seed=7)
    jax.block_until_ready(y_lin)
    assert y_lin.shape == (batch, n_output)

    print("KERNEL_OK")
</pallas_src>

<mosaic_0001>
module attributes {stable_mosaic.version = 11 : i64} {
  func.func @kernel(%arg0: i32, %arg1: memref<1xi32, #tpu.memory_space<smem>>, %arg2: memref<8x4xf32, #tpu.memory_space<vmem>>, %arg3: memref<4x32xf32, #tpu.memory_space<vmem>>, %arg4: memref<1x32xf32, #tpu.memory_space<vmem>>, %arg5: memref<32x32xf32, #tpu.memory_space<vmem>>, %arg6: memref<1x32xf32, #tpu.memory_space<vmem>>, %arg7: memref<32x32xf32, #tpu.memory_space<vmem>>, %arg8: memref<1x32xf32, #tpu.memory_space<vmem>>, %arg9: memref<32x128xf32, #tpu.memory_space<vmem>>, %arg10: memref<1x128xf32, #tpu.memory_space<vmem>>, %arg11: memref<8x128xf32, #tpu.memory_space<vmem>>) attributes {dimension_semantics = [#tpu.dimension_semantics<parallel>], iteration_bounds = array<i64: 1>, scalar_prefetch = 0 : i64, scratch_operands = 0 : i64, tpu.core_type = #tpu.core_type<tc>, window_params = [{transform_indices = @transform_0, window_bounds = array<i64: 1>}, {transform_indices = @transform_1, window_bounds = array<i64: 8, 4>}, {pipeline_mode = #tpu.pipeline_mode<synchronous>, transform_indices = @transform_2, window_bounds = array<i64: 4, 32>}, {pipeline_mode = #tpu.pipeline_mode<synchronous>, transform_indices = @transform_3, window_bounds = array<i64: 1, 32>}, {pipeline_mode = #tpu.pipeline_mode<synchronous>, transform_indices = @transform_4, window_bounds = array<i64: 32, 32>}, {pipeline_mode = #tpu.pipeline_mode<synchronous>, transform_indices = @transform_5, window_bounds = array<i64: 1, 32>}, {pipeline_mode = #tpu.pipeline_mode<synchronous>, transform_indices = @transform_6, window_bounds = array<i64: 32, 32>}, {pipeline_mode = #tpu.pipeline_mode<synchronous>, transform_indices = @transform_7, window_bounds = array<i64: 1, 32>}, {pipeline_mode = #tpu.pipeline_mode<synchronous>, transform_indices = @transform_8, window_bounds = array<i64: 32, 128>}, {pipeline_mode = #tpu.pipeline_mode<synchronous>, transform_indices = @transform_9, window_bounds = array<i64: 1, 128>}, {transform_indices = @transform_10, window_bounds = array<i64: 8, 128>}]} {
    %c0 = arith.constant 0 : index
    %c0_0 = arith.constant 0 : index
    %0 = vector.load %arg2[%c0, %c0_0] : memref<8x4xf32, #tpu.memory_space<vmem>>, vector<8x4xf32>
    %c0_1 = arith.constant 0 : index
    %c0_2 = arith.constant 0 : index
    %1 = vector.load %arg3[%c0_1, %c0_2] : memref<4x32xf32, #tpu.memory_space<vmem>>, vector<4x32xf32>
    %c0_3 = arith.constant 0 : index
    %c0_4 = arith.constant 0 : index
    %2 = vector.load %arg4[%c0_3, %c0_4] : memref<1x32xf32, #tpu.memory_space<vmem>>, vector<1x32xf32>
    %cst = arith.constant dense<0.000000e+00> : vector<8x32xf32>
    %3 = tpu.matmul %0, %1, %cst {dimension_numbers = #tpu.dot_dimension_numbers<[1], [0], [0], [1], [0, 0, 1, 1], [], []>} : vector<8x4xf32>, vector<4x32xf32>, vector<8x32xf32> -> vector<8x32xf32>
    %4 = vector.broadcast %2 : vector<1x32xf32> to vector<8x32xf32>
    %5 = arith.addf %3, %4 : vector<8x32xf32>
    %cst_5 = arith.constant 0.000000e+00 : f32
    %6 = vector.broadcast %cst_5 : f32 to vector<8x32xf32>
    %7 = arith.maximumf %5, %6 : vector<8x32xf32>
    %c0_6 = arith.constant 0 : index
    %c0_7 = arith.constant 0 : index
    %8 = vector.load %arg5[%c0_6, %c0_7] : memref<32x32xf32, #tpu.memory_space<vmem>>, vector<32x32xf32>
    %c0_8 = arith.constant 0 : index
    %c0_9 = arith.constant 0 : index
    %9 = vector.load %arg6[%c0_8, %c0_9] : memref<1x32xf32, #tpu.memory_space<vmem>>, vector<1x32xf32>
    %cst_10 = arith.constant dense<0.000000e+00> : vector<8x32xf32>
    %10 = tpu.matmul %7, %8, %cst_10 {dimension_numbers = #tpu.dot_dimension_numbers<[1], [0], [0], [1], [0, 0, 1, 1], [], []>} : vector<8x32xf32>, vector<32x32xf32>, vector<8x32xf32> -> vector<8x32xf32>
    %11 = vector.broadcast %9 : vector<1x32xf32> to vector<8x32xf32>
    %12 = arith.addf %10, %11 : vector<8x32xf32>
    %cst_11 = arith.constant 0.000000e+00 : f32
    %13 = vector.broadcast %cst_11 : f32 to vector<8x32xf32>
    %14 = arith.maximumf %12, %13 : vector<8x32xf32>
    %c0_12 = arith.constant 0 : index
    %c0_13 = arith.constant 0 : index
    %15 = vector.load %arg7[%c0_12, %c0_13] : memref<32x32xf32, #tpu.memory_space<vmem>>, vector<32x32xf32>
    %c0_14 = arith.constant 0 : index
    %c0_15 = arith.constant 0 : index
    %16 = vector.load %arg8[%c0_14, %c0_15] : memref<1x32xf32, #tpu.memory_space<vmem>>, vector<1x32xf32>
    %cst_16 = arith.constant dense<0.000000e+00> : vector<8x32xf32>
    %17 = tpu.matmul %14, %15, %cst_16 {dimension_numbers = #tpu.dot_dimension_numbers<[1], [0], [0], [1], [0, 0, 1, 1], [], []>} : vector<8x32xf32>, vector<32x32xf32>, vector<8x32xf32> -> vector<8x32xf32>
    %18 = vector.broadcast %16 : vector<1x32xf32> to vector<8x32xf32>
    %19 = arith.addf %17, %18 : vector<8x32xf32>
    %cst_17 = arith.constant 0.000000e+00 : f32
    %20 = vector.broadcast %cst_17 : f32 to vector<8x32xf32>
    %21 = arith.maximumf %19, %20 : vector<8x32xf32>
    %c0_18 = arith.constant 0 : index
    %c0_19 = arith.constant 0 : index
    %22 = vector.load %arg9[%c0_18, %c0_19] : memref<32x128xf32, #tpu.memory_space<vmem>>, vector<32x128xf32>
    %c0_20 = arith.constant 0 : index
    %c0_21 = arith.constant 0 : index
    %23 = vector.load %arg10[%c0_20, %c0_21] : memref<1x128xf32, #tpu.memory_space<vmem>>, vector<1x128xf32>
    %cst_22 = arith.constant dense<0.000000e+00> : vector<8x128xf32>
    %24 = tpu.matmul %21, %22, %cst_22 {dimension_numbers = #tpu.dot_dimension_numbers<[1], [0], [0], [1], [0, 0, 1, 1], [], []>} : vector<8x32xf32>, vector<32x128xf32>, vector<8x128xf32> -> vector<8x128xf32>
    %25 = vector.broadcast %23 : vector<1x128xf32> to vector<8x128xf32>
    %26 = arith.addf %24, %25 : vector<8x128xf32>
    %c0_23 = arith.constant 0 : index
    %c0_24 = arith.constant 0 : index
    %27 = vector.load %arg11[%c0_23, %c0_24] : memref<8x128xf32, #tpu.memory_space<vmem>>, vector<8x128xf32>
    tpu.vector_store %arg11[%c0_23, %c0_24], %26 {strides = array<i32>} : memref<8x128xf32, #tpu.memory_space<vmem>>, vector<8x128xf32>,
    return
  }
  func.func @transform_0(%arg0: i32) -> i32 {
    %c0_i32 = arith.constant 0 : i32
    %c0_i32_0 = arith.constant 0 : i32
    return %c0_i32 : i32
  }
  func.func @transform_1(%arg0: i32) -> (i32, i32) {
    %c0_i32 = arith.constant 0 : i32
    %c0_i32_0 = arith.constant 0 : i32
    return %arg0, %c0_i32 : i32, i32
  }
  func.func @transform_2(%arg0: i32) -> (i32, i32) {
    %c0_i32 = arith.constant 0 : i32
    %c0_i32_0 = arith.constant 0 : i32
    %c0_i32_1 = arith.constant 0 : i32
    return %c0_i32, %c0_i32_0 : i32, i32
  }
  func.func @transform_3(%arg0: i32) -> (i32, i32) {
    %c0_i32 = arith.constant 0 : i32
    %c0_i32_0 = arith.constant 0 : i32
    %c0_i32_1 = arith.constant 0 : i32
    return %c0_i32, %c0_i32_0 : i32, i32
  }
  func.func @transform_4(%arg0: i32) -> (i32, i32) {
    %c0_i32 = arith.constant 0 : i32
    %c0_i32_0 = arith.constant 0 : i32
    %c0_i32_1 = arith.constant 0 : i32
    return %c0_i32, %c0_i32_0 : i32, i32
  }
  func.func @transform_5(%arg0: i32) -> (i32, i32) {
    %c0_i32 = arith.constant 0 : i32
    %c0_i32_0 = arith.constant 0 : i32
    %c0_i32_1 = arith.constant 0 : i32
    return %c0_i32, %c0_i32_0 : i32, i32
  }
  func.func @transform_6(%arg0: i32) -> (i32, i32) {
    %c0_i32 = arith.constant 0 : i32
    %c0_i32_0 = arith.constant 0 : i32
    %c0_i32_1 = arith.constant 0 : i32
    return %c0_i32, %c0_i32_0 : i32, i32
  }
  func.func @transform_7(%arg0: i32) -> (i32, i32) {
    %c0_i32 = arith.constant 0 : i32
    %c0_i32_0 = arith.constant 0 : i32
    %c0_i32_1 = arith.constant 0 : i32
    return %c0_i32, %c0_i32_0 : i32, i32
  }
  func.func @transform_8(%arg0: i32) -> (i32, i32) {
    %c0_i32 = arith.constant 0 : i32
    %c0_i32_0 = arith.constant 0 : i32
    %c0_i32_1 = arith.constant 0 : i32
    return %c0_i32, %c0_i32_0 : i32, i32
  }
  func.func @transform_9(%arg0: i32) -> (i32, i32) {
    %c0_i32 = arith.constant 0 : i32
    %c0_i32_0 = arith.constant 0 : i32
    %c0_i32_1 = arith.constant 0 : i32
    return %c0_i32, %c0_i32_0 : i32, i32
  }
  func.func @transform_10(%arg0: i32) -> (i32, i32) {
    %c0_i32 = arith.constant 0 : i32
    %c0_i32_0 = arith.constant 0 : i32
    return %arg0, %c0_i32 : i32, i32
  }
}

</mosaic_0001>

<bundles_post_ra>
// kernel: tpu_custom_call.1
= control target key start
LH: loop header
LB: loop body
LE: loop exit
PB: predicated region body
PF: predicated region fallthrough
CT: control target
= control target key end

     0   :  { %16 = vsyncpa [#allocation4], 0  ;;  %s696_s0 = inlined_call_operand.<no memory space> [shape: s32[1], index: 0, kind: input, shape index: {}]   ;;  %s697_s1 = inlined_call_operand.vmem [shape: f32[8,4], index: 1, kind: input, shape index: {}]   ;;  %s698_s2 = inlined_call_operand.vmem [shape: f32[4,32], index: 2, kind: input, shape index: {}]   ;;  %s699_s3 = inlined_call_operand.vmem [shape: f32[1,32], index: 3, kind: input, shape index: {}]   ;;  %s700_s4 = inlined_call_operand.hbm [shape: f32[32,32], index: 4, kind: input, shape index: {}]   ;;  %s701_s5 = inlined_call_operand.vmem [shape: f32[1,32], index: 5, kind: input, shape index: {}]   ;;  %s702_s6 = inlined_call_operand.hbm [shape: f32[32,32], index: 6, kind: input, shape index: {}]   ;;  %s703_s7 = inlined_call_operand.vmem [shape: f32[1,32], index: 7, kind: input, shape index: {}]   ;;  %s704_s8 = inlined_call_operand.hbm [shape: f32[32,128], index: 8, kind: input, shape index: {}]   ;;  %s705_s9 = inlined_call_operand.vmem [shape: f32[1,128], index: 9, kind: input, shape index: {}]   ;;  %s706_s10 = inlined_call_operand.hbm [shape: f32[8,128], index: 10, kind: output, shape index: {}]  }
   0x1   :  { %17 = vsyncpa [#allocation7], 0 }
   0x2   :  { %18 = vsyncpa [#allocation5], 0  ;;  %s596_s12 = smov [#allocation6]   ;;  %s597_s14 = smov [#allocation3]  }
   0x3   :  { %s46_s13 = sshll.u32 %s596_s12, 4  ;;  %s32_s15 = sshll.u32 %s597_s14, 4  ;;  %s47_s13 = int_to_ptr.vmem [resolvable:$true] %s46_s13  ;;  %s33_s15 = int_to_ptr.vmem [resolvable:$true] %s32_s15 }
   0x4   :  { %s518_s16 = scalar_lea.vmem %s47_s13, 512  ;;  %p523_p1 = scmp.lt.s32.totalorder %s47_s13, %s47_s13 }
   0x5   :  { %p519_p0 = scmp.ne.s32.totalorder %s47_s13, %s518_s16  ;;  %p524_p2 = scmp.lt.s32.totalorder %s518_s16, %s518_s16 }
   0x7   :  { %p525_p3 = por %p524_p2, %p523_p1 }
   0x9   :  { %p526_p4 = pnand %p525_p3, %p519_p0 }
   0xb   :  { %529 = shalt.err (!%p526_p4)
}
   0xc   :  { %s598_s17 = smov 128   ;;  %s599_s18 = smov 8  }
   0xd   :  { %52 = dma.hbm_to_vmem [thread:$0]  %s702_s6, 512, %s47_s13, [#allocation7], %s598_s17, %s598_s17, %s599_s18  }
   0xe   :  { %s538_s21 = scalar_lea.vmem %s33_s15, 512  ;;  %p543_p6 = scmp.lt.s32.totalorder %s33_s15, %s33_s15 }
   0xf   :  { %p539_p5 = scmp.ne.s32.totalorder %s33_s15, %s538_s21  ;;  %p544_p7 = scmp.lt.s32.totalorder %s538_s21, %s538_s21 }
  0x11   :  { %p545_p8 = por %p544_p7, %p543_p6 }
  0x13   :  { %p546_p9 = pnand %p545_p8, %p539_p5 }
  0x15   :  { %549 = shalt.err (!%p546_p9)
}
  0x16   :  { %38 = dma.hbm_to_vmem [thread:$0]  %s700_s4, 512, %s33_s15, [#allocation4], %s598_s17, %s598_s17, %s599_s18  }
  0x17   :  { %s600_s24 = smov [#allocation8]  }
  0x18   :  { %s60_s25 = sshll.u32 %s600_s24, 4  ;;  %s61_s25 = int_to_ptr.vmem [resolvable:$true] %s60_s25 }
  0x19   :  { %s558_s0 = scalar_lea.vmem %s61_s25, 512  ;;  %p563_p11 = scmp.lt.s32.totalorder %s61_s25, %s61_s25 }
  0x1a   :  { %p559_p10 = scmp.ne.s32.totalorder %s61_s25, %s558_s0  ;;  %p564_p12 = scmp.lt.s32.totalorder %s558_s0, %s558_s0 }
  0x1c   :  { %p565_p13 = por %p564_p12, %p563_p11 }
  0x1e   :  { %p566_p0 = pnand %p565_p13, %p559_p10 }
  0x20   :  { %569 = shalt.err (!%p566_p0)
}
  0x21   :  { %66 = dma.hbm_to_vmem [thread:$0]  %s704_s8, 512, %s61_s25, [#allocation7], %s598_s17, %s598_s17, %s599_s18  }
  0x22   :  { %590 = dma.done.wait [#allocation4], 512  }
  0x23   :  { %591 = vsyncadd [#allocation4], 4294966784 }
  0x24   :  { %592 = dma.done.wait [#allocation7], 1024  }
  0x25   :  { %593 = vsyncadd [#allocation7], 4294966272  ;;  %v601_v0 = vmov 0.0   ;;  %vm602_vm0 = vmmov 0   ;;  %vm91_vm1 = vcmask 1043456   ;;  %vm87_vm2 = vcmask 31744  }
  0x26   :  { %464 = vmatprep.subr.mxu0 %v601_v0  ;;  %466 = vmatprep.mubr.msk.f32.mxu0 %vm602_vm0, %v601_v0  ;;  %v79_v1 = vld [vmem:[%s698_s2] sm:$0xf]  ;;  %v169_v3 = vld [vmem:[#allocation3 + $0x18] sm:$0xff]  ;;  %v168_v4 = vld [vmem:[#allocation3 + $0x10] sm:$0xff]  ;;  %vm177_vm3 = vcmask 261120   ;;  %s603_s13 = smov [#allocation9]  }
  0x27   :  { %469 = vmatprep.subr.mxu1 %v601_v0  ;;  %477 = vmatprep.mubr.msk.f32.mxu1 %vm602_vm0, %v601_v0  ;;  %v78_v2 = vld [vmem:[%s697_s1] sm:$0xff]  ;;  %v167_v5 = vld [vmem:[#allocation3 + $0x8] sm:$0xff]  ;;  %v255_v7 = vld [vmem:[#allocation6 + $0x18] sm:$0xff]  ;;  %s428_s14 = sshll.u32 %s603_s13, 4  ;;  %s429_s14 = int_to_ptr.vmem [resolvable:$true] %s428_s14 }
  0x28   :  { %465 = vmatpush3.msk.msra.mxu0 %vm91_vm1, %v79_v1  ;;  %470 = vmatpush3.msra.mxu1 %v169_v3  ;;  %v166_v6 = vld [vmem:[#allocation3] sm:$0xff]  ;;  %v254_v13 = vld [vmem:[#allocation6 + $0x10] sm:$0xff]  ;;  %v253_v14 = vld [vmem:[#allocation6 + $0x8] sm:$0xff]  ;;  %s570_s15 = scalar_lea.vmem %s429_s14, 128  ;;  %p575_p2 = scmp.lt.s32.totalorder %s429_s14, %s429_s14 }
  0x29   :  { %467 = vmatmul.mubr.msk.f32.vlgmr.msra.gmra.mxu0 %vm87_vm2, %v78_v2  ;;  %471 = vmatprep.subr.mxu1 %v601_v0  ;;  %v438_v8 = vld [vmem:[%s699_s3] ss:$0 sm:$0xff]  ;;  %v340_v16 = vld [vmem:[#allocation8 + $0x18] sm:$0xff]  ;;  %v339_v22 = vld [vmem:[#allocation8 + $0x10] sm:$0xff]  ;;  %p571_p1 = scmp.ne.s32.totalorder %s429_s14, %s570_s15  ;;  %p576_p3 = scmp.lt.s32.totalorder %s570_s15, %s570_s15 }
  0x2a   :  { %480 = vmatprep.subr.mxu0 %v601_v0  ;;  %488 = vmatprep.mubr.msk.f32.mxu0 %vm602_vm0, %v601_v0  ;;  %v252_v15 = vld [vmem:[#allocation6] sm:$0xff]  ;;  %v338_v23 = vld [vmem:[#allocation8 + $0x8] sm:$0xff] }
  0x2b   :  { %472 = vmatpush3.msra.mxu1 %v168_v4  ;;  %481 = vmatpush3.msra.mxu0 %v255_v7  ;;  %v441_v17 = vld [vmem:[%s701_s5] ss:$0 sm:$0xff]  ;;  %p577_p4 = por %p576_p3, %p575_p2 }
  0x2c   :  { %473 = vmatprep.subr.mxu1 %v601_v0  ;;  %482 = vmatprep.subr.mxu0 %v601_v0  ;;  %v337_v24 = vld [vmem:[#allocation8] sm:$0xff] }
  0x2d   :  { %474 = vmatpush3.msra.mxu1 %v167_v5  ;;  %483 = vmatpush3.msra.mxu0 %v254_v13  ;;  %v443_v25 = vld [vmem:[%s703_s7] ss:$0 sm:$0xff]  ;;  %p578_p5 = pnand %p577_p4, %p571_p1 }
  0x2e   :  { %475 = vmatprep.subr.mxu1 %v601_v0  ;;  %484 = vmatprep.subr.mxu0 %v601_v0  ;;  %v445_v30 = vld [vmem:[%s705_s9] ss:$0 sm:$0xff] }
  0x2f   :  { %476 = vmatpush3.msra.mxu1 %v166_v6  ;;  %485 = vmatpush3.msra.mxu0 %v253_v14 }
  0x30   :  { %491 = vmatprep.subr.mxu1 %v601_v0  ;;  %486 = vmatprep.subr.mxu0 %v601_v0 }
  0x31   :  { %487 = vmatpush3.msra.mxu0 %v252_v15 }
  0xe9   :  { %v161_v9 = vpop.f32.mrf.mxu0 }
  0xea   :  { %v162_v10 = vadd.f32 %v438_v8, %v161_v9 }
  0xeb   :  { %v468_v11 = vpop.f32.mrf.mxu0 }
  0xec   :  { %v165_v12 = vmax.f32 %v162_v10, 0.0 }
  0xee   :  { %478 = vmatmul.mubr.msk.f32.vlgmr.msra.gmra.mxu1 %vm177_vm3, %v165_v12 }
  0xef   :  { %499 = vmatprep.mubr.msk.f32.mxu1 %vm602_vm0, %v601_v0  ;;  %492 = vmatpush3.msra.mxu1 %v340_v16 }
  0xf0   :  { %493 = vmatprep.subr.mxu1 %v601_v0 }
  0xf1   :  { %494 = vmatpush3.msra.mxu1 %v339_v22 }
  0xf2   :  { %495 = vmatprep.subr.mxu1 %v601_v0 }
  0xf3   :  { %496 = vmatpush3.msra.mxu1 %v338_v23 }
  0xf4   :  { %497 = vmatprep.subr.mxu1 %v601_v0 }
  0xf5   :  { %498 = vmatpush3.msra.mxu1 %v337_v24 }
 0x1ae   :  { %v247_v18 = vpop.f32.mrf.mxu1 }
 0x1af   :  { %v248_v19 = vadd.f32 %v441_v17, %v247_v18 }
 0x1b0   :  { %v479_v20 = vpop.f32.mrf.mxu1 }
 0x1b1   :  { %v251_v21 = vmax.f32 %v248_v19, 0.0 }
 0x1b3   :  { %489 = vmatmul.mubr.msk.f32.vlgmr.msra.gmra.mxu0 %vm177_vm3, %v251_v21 }
 0x273   :  { %v332_v26 = vpop.f32.mrf.mxu0 }
 0x274   :  { %v333_v27 = vadd.f32 %v443_v25, %v332_v26 }
 0x275   :  { %v490_v28 = vpop.f32.mrf.mxu0 }
 0x276   :  { %v336_v29 = vmax.f32 %v333_v27, 0.0 }
 0x278   :  { %500 = vmatmul.mubr.msk.f32.vlgmr.msra.gmra.mxu1 %vm177_vm3, %v336_v29 }
 0x338   :  { %v417_v31 = vpop.f32.mrf.mxu1 }
 0x339   :  { %v418_v32 = vadd.f32 %v445_v30, %v417_v31 }
 0x33a   :  { %v501_v33 = vpop.f32.mrf.mxu1 }
 0x33b   :  { %421 = vst [vmem:[#allocation9] sm:$0xff] %v418_v32 }
 0x33c   :  { %581 = shalt.err (!%p578_p5)
}
 0x33d   :  { %431 = dma.vmem_to_hbm [thread:$0]  %s429_s14, 128, %s706_s10, [#allocation5]  }
 0x33e   :  { %594 = dma.done.wait [#allocation5], 128  }
 0x33f   :  { %595 = vsyncadd [#allocation5], 4294967168 }
 0x340   :  { %435 = vsyncpa [#allocation4], 1 }
 0x341   :  { %436 = vsyncpa [#allocation7], 1 }
 0x342   :  { %437 = vsyncpa [#allocation5], 1 }

</bundles_post_ra>
